<compile_context>
chip_gen: v7x
topology: tpu7x:2x2x1
jax: 0.10.0
libtpu: 0.0.40
codegen_flags: <defaults>
</compile_context>

<pallas_src>
import functools

import jax
import jax.numpy as jnp
from jax.experimental import pallas as pl
from jax.experimental.pallas import tpu as pltpu

HIDDEN = 128


def _cdiv(a, b):
    return -(-a // b)


def _round_up(x, m):
    return _cdiv(x, m) * m


def policy_kernel(x_ref, w1_ref, b1_ref, w2_ref, b2_ref, wh_ref, bh_ref,
                  out_ref, *, action_dim):
    x = x_ref[...]                       # [TB, obs_dim] f32
    w1 = w1_ref[...]                     # [obs_dim, H]  f32
    obs_dim = x.shape[1]

    # --- shared_first: K = obs_dim (~4) -> unrolled VPU broadcast-FMA, skip MXU ---
    acc = x[:, 0:1] * w1[0:1, :]
    for k in range(1, obs_dim):          # static unroll (obs_dim ~ 4)
        acc = acc + x[:, k:k + 1] * w1[k:k + 1, :]
    h1 = jnp.maximum(acc + b1_ref[...], 0.0)
    # Dropout(p=0.1): identity in eval mode.

    # --- shared_second: 128x128 MXU matmul, bf16 operands, f32 accumulate ---
    h2 = jnp.dot(h1.astype(jnp.bfloat16), w2_ref[...],
                 preferred_element_type=jnp.float32) + b2_ref[...]
    h2 = jnp.maximum(h2, 0.0)

    # --- fused heads: narrow [H, head_w] matmul -> [action logits | value | pad] ---
    logits = jnp.dot(h2.astype(jnp.bfloat16), wh_ref[...],
                     preferred_element_type=jnp.float32) + bh_ref[...]

    head_w = logits.shape[1]
    col = jax.lax.broadcasted_iota(jnp.int32, (1, head_w), 1)     # (1, head_w)
    act_bias = jnp.where(col < action_dim, 0.0, -jnp.inf)         # (1, head_w)
    val_sel = jnp.where(col == action_dim, 1.0, 0.0)              # (1, head_w)

    # Softmax over action columns only; value/pad columns -> -inf BEFORE exp.
    masked = logits + act_bias
    m = jnp.max(masked, axis=-1, keepdims=True)
    e = jnp.exp(masked - m)              # masked columns give exactly 0
    s = jnp.sum(e, axis=-1, keepdims=True)
    probs = e / s                        # exact division: rows sum to 1

    # Output slab [probs | value | zeros]: single narrow (head_w-lane) store.
    out_ref[...] = probs + logits * val_sel


@functools.partial(jax.jit, static_argnames=("action_dim", "tile_b"))
def policy_forward(state, params, *, action_dim, tile_b=1024):
    """state: [B, obs_dim] f32 -> (action_prob [B, action_dim], value [B, 1])."""
    B, obs_dim = state.shape
    hidden = params["w1"].shape[1]
    head_w = params["wh"].shape[1]
    assert action_dim + 1 <= head_w, "fused head too narrow for action_dim + value"

    # Balanced tiling: choose grid first, then tile (padding bounded to <8 rows
    # per block).  Force >=2 steps when B is big enough so both v7x TCs get work.
    grid_n = max(1, _cdiv(B, tile_b))
    if grid_n == 1 and B >= 16:
        grid_n = 2
    tb = _round_up(_cdiv(B, grid_n), 8)
    b_pad = grid_n * tb
    if b_pad != B:
        state = jnp.pad(state, ((0, b_pad - B), (0, 0)))

    resident = lambda i: (0, 0)          # weights/biases stay VMEM-resident

    flops = b_pad * (2 * obs_dim * hidden + 2 * hidden * hidden
                     + 2 * hidden * head_w + 8 * head_w)
    bytes_accessed = (b_pad * obs_dim * 4 + b_pad * head_w * 4
                      + sum(int(v.size) * v.dtype.itemsize for v in params.values()))

    out = pl.pallas_call(
        functools.partial(policy_kernel, action_dim=action_dim),
        out_shape=jax.ShapeDtypeStruct((b_pad, head_w), jnp.float32),
        grid=(grid_n,),
        in_specs=[
            pl.BlockSpec((tb, obs_dim), lambda i: (i, 0)),
            pl.BlockSpec((obs_dim, hidden), resident),
            pl.BlockSpec((1, hidden), resident),
            pl.BlockSpec((hidden, hidden), resident),
            pl.BlockSpec((1, hidden), resident),
            pl.BlockSpec((hidden, head_w), resident),
            pl.BlockSpec((1, head_w), resident),
        ],
        out_specs=pl.BlockSpec((tb, head_w), lambda i: (i, 0)),
        compiler_params=pltpu.CompilerParams(
            dimension_semantics=("parallel",),
            vmem_limit_bytes=32 * 1024 * 1024),
        cost_estimate=pl.CostEstimate(
            flops=int(flops),
            transcendentals=int(b_pad * head_w),
            bytes_accessed=int(bytes_accessed)),
    )(state,
      params["w1"], params["b1"], params["w2"], params["b2"],
      params["wh"], params["bh"])

    # One contiguous narrow slice (action_dim+1 of head_w lanes), then split:
    # no re-read of a wide padded slab in the wrapper.
    out = out[:B, :action_dim + 1]
    return out[:, :action_dim], out[:, action_dim:]


def init_params(key, obs_dim, hidden, action_dim):
    """kaiming_normal_ weights (std = sqrt(2/fan_in)); PyTorch-default biases
    U(-1/sqrt(fan_in), 1/sqrt(fan_in)).  Weights stored transposed [in, out].
    Action/value heads fused into a narrow [hidden, round_up(action_dim+1, 8)]
    slab: cols [0:action_dim] = action head, col action_dim = value head, rest 0."""
    head_w = _round_up(action_dim + 1, 8)
    ks = jax.random.split(key, 8)

    def kaiming(k, fan_in, fan_out):
        std = (2.0 / fan_in) ** 0.5
        # PyTorch weight is [out, in]; transpose to [in, out].
        return (jax.random.normal(k, (fan_out, fan_in), jnp.float32) * std).T

    def bias(k, fan_in, fan_out):
        bound = 1.0 / (fan_in ** 0.5)
        return jax.random.uniform(k, (1, fan_out), jnp.float32, -bound, bound)

    w1 = kaiming(ks[0], obs_dim, hidden)
    b1 = bias(ks[1], obs_dim, hidden)
    w2 = kaiming(ks[2], hidden, hidden)
    b2 = bias(ks[3], hidden, hidden)
    wa = kaiming(ks[4], hidden, action_dim)
    ba = bias(ks[5], hidden, action_dim)
    wv = kaiming(ks[6], hidden, 1)
    bv = bias(ks[7], hidden, 1)

    wh = jnp.zeros((hidden, head_w), jnp.float32)
    wh = wh.at[:, :action_dim].set(wa).at[:, action_dim:action_dim + 1].set(wv)
    bh = jnp.zeros((1, head_w), jnp.float32)
    bh = bh.at[:, :action_dim].set(ba).at[:, action_dim:action_dim + 1].set(bv)

    return {
        "w1": w1, "b1": b1,
        "w2": w2.astype(jnp.bfloat16), "b2": b2,   # bf16 MXU operands
        "wh": wh.astype(jnp.bfloat16), "bh": bh,
    }


def policy_reference(state, params, action_dim):
    """Pure-JAX reference mirroring the kernel math (bf16 matmuls, f32 acc)."""
    h1 = jnp.maximum(state @ params["w1"] + params["b1"], 0.0)
    h2 = jnp.maximum(
        jnp.dot(h1.astype(jnp.bfloat16), params["w2"],
                preferred_element_type=jnp.float32) + params["b2"], 0.0)
    logits = jnp.dot(h2.astype(jnp.bfloat16), params["wh"],
                     preferred_element_type=jnp.float32) + params["bh"]
    probs = jax.nn.softmax(logits[:, :action_dim], axis=-1)
    value = logits[:, action_dim:action_dim + 1]
    return probs, value


if __name__ == "__main__":
    # CartPole-like shapes: obs_dim=4, 2 discrete actions, hidden=128.
    B, OBS_DIM, ACTION_DIM = 8, 4, 2

    key = jax.random.PRNGKey(0)
    pkey, xkey = jax.random.split(key)
    params = init_params(pkey, OBS_DIM, HIDDEN, ACTION_DIM)
    state = jax.random.normal(xkey, (B, OBS_DIM), jnp.float32)

    action_prob, state_value = policy_forward(state, params, action_dim=ACTION_DIM)
    jax.block_until_ready((action_prob, state_value))

    assert action_prob.shape == (B, ACTION_DIM)
    assert state_value.shape == (B, 1)
    # Exact-division softmax: rows sum to 1 to f32 precision.
    assert bool(jnp.all(jnp.abs(jnp.sum(action_prob, axis=-1) - 1.0) < 1e-4))

    ref_prob, ref_val = policy_reference(state, params, ACTION_DIM)
    assert bool(jnp.allclose(action_prob, ref_prob, atol=5e-3))
    assert bool(jnp.allclose(state_value, ref_val, atol=5e-3, rtol=1e-2))

    print("KERNEL_OK")
</pallas_src>

<mosaic_0001>
module attributes {stable_mosaic.version = 11 : i64} {
  func.func @policy_kernel(%arg0: i32, %arg1: memref<8x4xf32, #tpu.memory_space<vmem>>, %arg2: memref<4x128xf32, #tpu.memory_space<vmem>>, %arg3: memref<1x128xf32, #tpu.memory_space<vmem>>, %arg4: memref<128x128xbf16, #tpu.memory_space<vmem>>, %arg5: memref<1x128xf32, #tpu.memory_space<vmem>>, %arg6: memref<128x8xbf16, #tpu.memory_space<vmem>>, %arg7: memref<1x8xf32, #tpu.memory_space<vmem>>, %arg8: memref<8x8xf32, #tpu.memory_space<vmem>>) attributes {dimension_semantics = [#tpu.dimension_semantics<parallel>], iteration_bounds = array<i64: 1>, scalar_prefetch = 0 : i64, scratch_operands = 0 : i64, tpu.core_type = #tpu.core_type<tc>, window_params = [{transform_indices = @transform_0, window_bounds = array<i64: 8, 4>}, {pipeline_mode = #tpu.pipeline_mode<synchronous>, transform_indices = @transform_1, window_bounds = array<i64: 4, 128>}, {pipeline_mode = #tpu.pipeline_mode<synchronous>, transform_indices = @transform_2, window_bounds = array<i64: 1, 128>}, {pipeline_mode = #tpu.pipeline_mode<synchronous>, transform_indices = @transform_3, window_bounds = array<i64: 128, 128>}, {pipeline_mode = #tpu.pipeline_mode<synchronous>, transform_indices = @transform_4, window_bounds = array<i64: 1, 128>}, {pipeline_mode = #tpu.pipeline_mode<synchronous>, transform_indices = @transform_5, window_bounds = array<i64: 128, 8>}, {pipeline_mode = #tpu.pipeline_mode<synchronous>, transform_indices = @transform_6, window_bounds = array<i64: 1, 8>}, {transform_indices = @transform_7, window_bounds = array<i64: 8, 8>}]} {
    %c0 = arith.constant 0 : index
    %c0_0 = arith.constant 0 : index
    %0 = vector.load %arg1[%c0, %c0_0] : memref<8x4xf32, #tpu.memory_space<vmem>>, vector<8x4xf32>
    %c0_1 = arith.constant 0 : index
    %c0_2 = arith.constant 0 : index
    %1 = vector.load %arg2[%c0_1, %c0_2] : memref<4x128xf32, #tpu.memory_space<vmem>>, vector<4x128xf32>
    %2 = vector.extract_strided_slice %0 {offsets = [0, 0], sizes = [8, 1], strides = [1, 1]} : vector<8x4xf32> to vector<8x1xf32>
    %3 = vector.extract_strided_slice %1 {offsets = [0, 0], sizes = [1, 128], strides = [1, 1]} : vector<4x128xf32> to vector<1x128xf32>
    %4 = vector.broadcast %2 : vector<8x1xf32> to vector<8x128xf32>
    %5 = vector.broadcast %3 : vector<1x128xf32> to vector<8x128xf32>
    %6 = arith.mulf %4, %5 : vector<8x128xf32>
    %7 = vector.extract_strided_slice %0 {offsets = [0, 1], sizes = [8, 1], strides = [1, 1]} : vector<8x4xf32> to vector<8x1xf32>
    %8 = vector.extract_strided_slice %1 {offsets = [1, 0], sizes = [1, 128], strides = [1, 1]} : vector<4x128xf32> to vector<1x128xf32>
    %9 = vector.broadcast %7 : vector<8x1xf32> to vector<8x128xf32>
    %10 = vector.broadcast %8 : vector<1x128xf32> to vector<8x128xf32>
    %11 = arith.mulf %9, %10 : vector<8x128xf32>
    %12 = arith.addf %6, %11 : vector<8x128xf32>
    %13 = vector.extract_strided_slice %0 {offsets = [0, 2], sizes = [8, 1], strides = [1, 1]} : vector<8x4xf32> to vector<8x1xf32>
    %14 = vector.extract_strided_slice %1 {offsets = [2, 0], sizes = [1, 128], strides = [1, 1]} : vector<4x128xf32> to vector<1x128xf32>
    %15 = vector.broadcast %13 : vector<8x1xf32> to vector<8x128xf32>
    %16 = vector.broadcast %14 : vector<1x128xf32> to vector<8x128xf32>
    %17 = arith.mulf %15, %16 : vector<8x128xf32>
    %18 = arith.addf %12, %17 : vector<8x128xf32>
    %19 = vector.extract_strided_slice %0 {offsets = [0, 3], sizes = [8, 1], strides = [1, 1]} : vector<8x4xf32> to vector<8x1xf32>
    %20 = vector.extract_strided_slice %1 {offsets = [3, 0], sizes = [1, 128], strides = [1, 1]} : vector<4x128xf32> to vector<1x128xf32>
    %21 = vector.broadcast %19 : vector<8x1xf32> to vector<8x128xf32>
    %22 = vector.broadcast %20 : vector<1x128xf32> to vector<8x128xf32>
    %23 = arith.mulf %21, %22 : vector<8x128xf32>
    %24 = arith.addf %18, %23 : vector<8x128xf32>
    %c0_3 = arith.constant 0 : index
    %c0_4 = arith.constant 0 : index
    %25 = vector.load %arg3[%c0_3, %c0_4] : memref<1x128xf32, #tpu.memory_space<vmem>>, vector<1x128xf32>
    %26 = vector.broadcast %25 : vector<1x128xf32> to vector<8x128xf32>
    %27 = arith.addf %24, %26 : vector<8x128xf32>
    %cst = arith.constant 0.000000e+00 : f32
    %28 = vector.broadcast %cst : f32 to vector<8x128xf32>
    %29 = arith.maximumf %27, %28 : vector<8x128xf32>
    %30 = arith.truncf %29 : vector<8x128xf32> to vector<8x128xbf16>
    %c0_5 = arith.constant 0 : index
    %c0_6 = arith.constant 0 : index
    %31 = vector.load %arg4[%c0_5, %c0_6] : memref<128x128xbf16, #tpu.memory_space<vmem>>, vector<128x128xbf16>
    %cst_7 = arith.constant dense<0.000000e+00> : vector<8x128xf32>
    %32 = tpu.matmul %30, %31, %cst_7 {dimension_numbers = #tpu.dot_dimension_numbers<[1], [0], [0], [1], [0, 0, 1, 1], [], []>} : vector<8x128xbf16>, vector<128x128xbf16>, vector<8x128xf32> -> vector<8x128xf32>
    %c0_8 = arith.constant 0 : index
    %c0_9 = arith.constant 0 : index
    %33 = vector.load %arg5[%c0_8, %c0_9] : memref<1x128xf32, #tpu.memory_space<vmem>>, vector<1x128xf32>
    %34 = vector.broadcast %33 : vector<1x128xf32> to vector<8x128xf32>
    %35 = arith.addf %32, %34 : vector<8x128xf32>
    %cst_10 = arith.constant 0.000000e+00 : f32
    %36 = vector.broadcast %cst_10 : f32 to vector<8x128xf32>
    %37 = arith.maximumf %35, %36 : vector<8x128xf32>
    %38 = arith.truncf %37 : vector<8x128xf32> to vector<8x128xbf16>
    %c0_11 = arith.constant 0 : index
    %c0_12 = arith.constant 0 : index
    %39 = vector.load %arg6[%c0_11, %c0_12] : memref<128x8xbf16, #tpu.memory_space<vmem>>, vector<128x8xbf16>
    %cst_13 = arith.constant dense<0.000000e+00> : vector<8x8xf32>
    %40 = tpu.matmul %38, %39, %cst_13 {dimension_numbers = #tpu.dot_dimension_numbers<[1], [0], [0], [1], [0, 0, 1, 1], [], []>} : vector<8x128xbf16>, vector<128x8xbf16>, vector<8x8xf32> -> vector<8x8xf32>
    %c0_14 = arith.constant 0 : index
    %c0_15 = arith.constant 0 : index
    %41 = vector.load %arg7[%c0_14, %c0_15] : memref<1x8xf32, #tpu.memory_space<vmem>>, vector<1x8xf32>
    %42 = vector.broadcast %41 : vector<1x8xf32> to vector<8x8xf32>
    %43 = arith.addf %40, %42 : vector<8x8xf32>
    %44 = tpu.iota {dimensions = array<i32: 1>} : vector<1x8xi32>
    %c2_i32 = arith.constant 2 : i32
    %45 = vector.broadcast %c2_i32 : i32 to vector<1x8xi32>
    %46 = arith.cmpi slt, %44, %45 : vector<1x8xi32>
    %cst_16 = arith.constant 0.000000e+00 : f32
    %cst_17 = arith.constant 0xFF800000 : f32
    %47 = vector.broadcast %cst_16 : f32 to vector<1x8xf32>
    %48 = vector.broadcast %cst_17 : f32 to vector<1x8xf32>
    %49 = arith.select %46, %47, %48 : vector<1x8xi1>, vector<1x8xf32>
    %c2_i32_18 = arith.constant 2 : i32
    %50 = vector.broadcast %c2_i32_18 : i32 to vector<1x8xi32>
    %51 = arith.cmpi eq, %44, %50 : vector<1x8xi32>
    %cst_19 = arith.constant 1.000000e+00 : f32
    %cst_20 = arith.constant 0.000000e+00 : f32
    %52 = vector.broadcast %cst_19 : f32 to vector<1x8xf32>
    %53 = vector.broadcast %cst_20 : f32 to vector<1x8xf32>
    %54 = arith.select %51, %52, %53 : vector<1x8xi1>, vector<1x8xf32>
    %55 = vector.broadcast %49 : vector<1x8xf32> to vector<8x8xf32>
    %56 = arith.addf %43, %55 : vector<8x8xf32>
    %cst_21 = arith.constant dense<0xFF800000> : vector<8xf32>
    %57 = vector.multi_reduction <maximumf>, %56, %cst_21 [1] : vector<8x8xf32> to vector<8xf32>
    %58 = vector.shape_cast %57 : vector<8xf32> to vector<8x1xf32>
    %59 = vector.broadcast %58 : vector<8x1xf32> to vector<8x8xf32>
    %60 = arith.subf %56, %59 : vector<8x8xf32>
    %61 = math.exp %60 : vector<8x8xf32>
    %cst_22 = arith.constant dense<0.000000e+00> : vector<8xf32>
    %62 = vector.multi_reduction <add>, %61, %cst_22 [1] : vector<8x8xf32> to vector<8xf32>
    %63 = vector.shape_cast %62 : vector<8xf32> to vector<8x1xf32>
    %64 = vector.broadcast %63 : vector<8x1xf32> to vector<8x8xf32>
    %65 = arith.divf %61, %64 : vector<8x8xf32>
    %66 = vector.broadcast %54 : vector<1x8xf32> to vector<8x8xf32>
    %67 = arith.mulf %43, %66 : vector<8x8xf32>
    %68 = arith.addf %65, %67 : vector<8x8xf32>
    %c0_23 = arith.constant 0 : index
    %c0_24 = arith.constant 0 : index
    %69 = vector.load %arg8[%c0_23, %c0_24] : memref<8x8xf32, #tpu.memory_space<vmem>>, vector<8x8xf32>
    tpu.vector_store %arg8[%c0_23, %c0_24], %68 {strides = array<i32>} : memref<8x8xf32, #tpu.memory_space<vmem>>, vector<8x8xf32>,
    return
  }
  func.func @transform_0(%arg0: i32) -> (i32, i32) {
    %c0_i32 = arith.constant 0 : i32
    %c0_i32_0 = arith.constant 0 : i32
    return %arg0, %c0_i32 : i32, i32
  }
  func.func @transform_1(%arg0: i32) -> (i32, i32) {
    %c0_i32 = arith.constant 0 : i32
    %c0_i32_0 = arith.constant 0 : i32
    %c0_i32_1 = arith.constant 0 : i32
    return %c0_i32, %c0_i32_0 : i32, i32
  }
  func.func @transform_2(%arg0: i32) -> (i32, i32) {
    %c0_i32 = arith.constant 0 : i32
    %c0_i32_0 = arith.constant 0 : i32
    %c0_i32_1 = arith.constant 0 : i32
    return %c0_i32, %c0_i32_0 : i32, i32
  }
  func.func @transform_3(%arg0: i32) -> (i32, i32) {
    %c0_i32 = arith.constant 0 : i32
    %c0_i32_0 = arith.constant 0 : i32
    %c0_i32_1 = arith.constant 0 : i32
    return %c0_i32, %c0_i32_0 : i32, i32
  }
  func.func @transform_4(%arg0: i32) -> (i32, i32) {
    %c0_i32 = arith.constant 0 : i32
    %c0_i32_0 = arith.constant 0 : i32
    %c0_i32_1 = arith.constant 0 : i32
    return %c0_i32, %c0_i32_0 : i32, i32
  }
  func.func @transform_5(%arg0: i32) -> (i32, i32) {
    %c0_i32 = arith.constant 0 : i32
    %c0_i32_0 = arith.constant 0 : i32
    %c0_i32_1 = arith.constant 0 : i32
    return %c0_i32, %c0_i32_0 : i32, i32
  }
  func.func @transform_6(%arg0: i32) -> (i32, i32) {
    %c0_i32 = arith.constant 0 : i32
    %c0_i32_0 = arith.constant 0 : i32
    %c0_i32_1 = arith.constant 0 : i32
    return %c0_i32, %c0_i32_0 : i32, i32
  }
  func.func @transform_7(%arg0: i32) -> (i32, i32) {
    %c0_i32 = arith.constant 0 : i32
    %c0_i32_0 = arith.constant 0 : i32
    return %arg0, %c0_i32 : i32, i32
  }
}

</mosaic_0001>

<bundles_post_ra>
// kernel: policy_forward.1
= control target key start
LH: loop header
LB: loop body
LE: loop exit
PB: predicated region body
PF: predicated region fallthrough
CT: control target
= control target key end

     0   :  { %v438_v0 = vmov 0   ;;  %v439_v2 = vmov 2   ;;  %v440_v4 = vmov 0.0   ;;  %v441_v6 = vmov 1   ;;  %s573_s0 = inlined_call_operand.vmem [shape: f32[8,4], index: 0, kind: input, shape index: {}]   ;;  %s574_s3 = inlined_call_operand.vmem [shape: bf16[128,128], index: 3, kind: input, shape index: {}]   ;;  %s575_s5 = inlined_call_operand.vmem [shape: bf16[128,8], index: 5, kind: input, shape index: {}]   ;;  %s576_s1 = inlined_call_operand.vmem [shape: f32[4,128], index: 1, kind: input, shape index: {}]   ;;  %s577_s2 = inlined_call_operand.vmem [shape: f32[1,128], index: 2, kind: input, shape index: {}]   ;;  %s578_s4 = inlined_call_operand.vmem [shape: f32[1,128], index: 4, kind: input, shape index: {}]   ;;  %s579_s6 = inlined_call_operand.vmem [shape: f32[1,8], index: 6, kind: input, shape index: {}]   ;;  %s580_s7 = inlined_call_operand.vmem [shape: f32[8,8], index: 7, kind: output, shape index: {}]  }
   0x1   :  { %413 = vset.pattern.permute.xlu0 %v438_v0  ;;  %v27_v1 = vld [vmem:[%s573_s0] sm:$0xff]  ;;  %415 = vset.pattern.permute.xlu1 %v439_v2  ;;  %v419_v5 = vld [vmem:[%s574_s3 + $0x8] sm:$0xff]   ;;  %v442_v7 = vmov 3   ;;  %v420_v8 = vld [vmem:[%s574_s3 + $0x10] sm:$0xff]   ;;  %vm443_vm0 = vmmov 0   ;;  %v34_v20 = vlaneseq  ;;  %v444_v60 = vmov -inf  }
   0x2   :  { %31 = vperm.xlu0 %413, %v27_v1   ;;  %50 = vperm.xlu1 %415, %v27_v1   ;;  %v418_v3 = vld [vmem:[%s574_s3] sm:$0xff]   ;;  %v421_v9 = vld [vmem:[%s574_s3 + $0x18] sm:$0xff]   ;;  %v423_v11 = vld [vmem:[%s574_s3 + $0x28] sm:$0xff]   ;;  %vm310_vm3 = vcmask 64512  }
   0x3   :  { %366 = vmatprep.subr.bf16.mxu0 %v440_v4  ;;  %386 = vmatprep.subr.bf16.mxu1 %v440_v4  ;;  %v422_v10 = vld [vmem:[%s574_s3 + $0x20] sm:$0xff]   ;;  %v424_v13 = vld [vmem:[%s574_s3 + $0x30] sm:$0xff]   ;;  %v427_v14 = vld [vmem:[%s575_s5 + $0x8] sm:$0xff]   ;;  %v35_v21 = vshrl.u32 %v34_v20, 7  ;;  %v304_v56 = vand.u32 127, %v34_v20 }
   0x4   :  { %367 = vmatpush3.bf16.msra.mxu0 %v418_v3  ;;  %382 = vmatprep.mubr.msk.bf16.mxu0 %vm443_vm0, %v440_v4  ;;  %v426_v12 = vld [vmem:[%s575_s5] sm:$0xff]   ;;  %v425_v15 = vld [vmem:[%s574_s3 + $0x38] sm:$0xff]   ;;  %v428_v16 = vld [vmem:[%s575_s5 + $0x10] sm:$0xff]  }
   0x5   :  { %368 = vmatprep.subr.bf16.mxu0 %v440_v4  ;;  %402 = vmatprep.mubr.msk.bf16.mxu1 %vm443_vm0, %v440_v4  ;;  %v429_v17 = vld [vmem:[%s575_s5 + $0x18] sm:$0xff]   ;;  %v430_v18 = vld [vmem:[%s575_s5 + $0x20] sm:$0xff]   ;;  %v431_v19 = vld [vmem:[%s575_s5 + $0x28] sm:$0xff]   ;;  %v36_v22 = vsub.s32 0, %v35_v21  ;;  %v45_v23 = vsub.s32 1, %v35_v21  ;;  %v55_v26 = vsub.s32 2, %v35_v21 }
   0x6   :  { %414 = vset.pattern.permute.xlu0 %v441_v6  ;;  %416 = vset.pattern.permute.xlu1 %v442_v7  ;;  %v28_v24 = vld [vmem:[%s576_s1] sm:$0xf]  ;;  %v65_v28 = vsub.s32 3, %v35_v21  ;;  %v432_v46 = vld [vmem:[%s575_s5 + $0x30] sm:$0xff]   ;;  %v433_v47 = vld [vmem:[%s575_s5 + $0x38] sm:$0xff]   ;;  %vm307_vm1 = vcmp.eq.s32.totalorder %v304_v56, 2 }
   0x7   :  { %40 = vperm.xlu0 %414, %v27_v1   ;;  %60 = vperm.xlu1 %416, %v27_v1   ;;  %v37_v29 = vrot.slane %v28_v24, %v36_v22  ;;  %v46_v30 = vrot.slane %v28_v24, %v45_v23  ;;  %v56_v31 = vrot.slane %v28_v24, %v55_v26  ;;  %v329_v41 = vld [vmem:[%s577_s2] ss:$0 sm:$0xff]  ;;  %vm305_vm2 = vcmp.lt.s32.totalorder %v304_v56, 2 }
   0x8   :  { %369 = vmatpush3.bf16.msra.mxu0 %v419_v5  ;;  %387 = vmatpush3.bf16.msra.mxu1 %v426_v12  ;;  %v66_v32 = vrot.slane %v28_v24, %v65_v28  ;;  %v330_v48 = vld [vmem:[%s578_s4] ss:$0 sm:$0xff]  ;;  %v308_v59 = vsel %vm307_vm1, 1.0, %v440_v4  ;;  %v306_v61 = vsel %vm305_vm2, 0.0, %v444_v60 }
   0x9   :  { %370 = vmatprep.subr.bf16.mxu0 %v440_v4  ;;  %388 = vmatprep.subr.bf16.mxu1 %v440_v4  ;;  %v339_v57 = vld [vmem:[%s579_s6] ss:$0 sm:$0xff] }
   0xb   :  { %417 = vset.pattern.permute.xlu0 %v442_v7 }
   0xc   :  { %371 = vmatpush3.bf16.msra.mxu0 %v420_v8  ;;  %389 = vmatpush3.bf16.msra.mxu1 %v427_v14 }
   0xd   :  { %372 = vmatprep.subr.bf16.mxu0 %v440_v4  ;;  %390 = vmatprep.subr.bf16.mxu1 %v440_v4 }
  0x10   :  { %373 = vmatpush3.bf16.msra.mxu0 %v421_v9  ;;  %391 = vmatpush3.bf16.msra.mxu1 %v428_v16 }
  0x11   :  { %374 = vmatprep.subr.bf16.mxu0 %v440_v4  ;;  %392 = vmatprep.subr.bf16.mxu1 %v440_v4 }
  0x14   :  { %375 = vmatpush3.bf16.msra.mxu0 %v422_v10  ;;  %393 = vmatpush3.bf16.msra.mxu1 %v429_v17 }
  0x15   :  { %376 = vmatprep.subr.bf16.mxu0 %v440_v4  ;;  %394 = vmatprep.subr.bf16.mxu1 %v440_v4 }
  0x18   :  { %377 = vmatpush3.bf16.msra.mxu0 %v423_v11  ;;  %395 = vmatpush3.bf16.msra.mxu1 %v430_v18 }
  0x19   :  { %378 = vmatprep.subr.bf16.mxu0 %v440_v4  ;;  %396 = vmatprep.subr.bf16.mxu1 %v440_v4 }
  0x1c   :  { %379 = vmatpush3.bf16.msra.mxu0 %v424_v13  ;;  %397 = vmatpush3.bf16.msra.mxu1 %v431_v19 }
  0x1d   :  { %380 = vmatprep.subr.bf16.mxu0 %v440_v4  ;;  %398 = vmatprep.subr.bf16.mxu1 %v440_v4 }
  0x20   :  { %381 = vmatpush3.bf16.msra.mxu0 %v425_v15  ;;  %399 = vmatpush3.bf16.msra.mxu1 %v432_v46 }
  0x21   :  { %400 = vmatprep.subr.bf16.mxu1 %v440_v4 }
  0x24   :  { %401 = vmatpush3.bf16.msra.mxu1 %v433_v47 }
  0x81   :  { %v32_v25 = vpop.permute.xlu0 %31  ;;  %v51_v27 = vpop.permute.xlu1 %50 }
  0x82   :  { %v38_v35 = vmul.f32 %v37_v29, %v32_v25  ;;  %v57_v37 = vmul.f32 %v56_v31, %v51_v27 }
  0x86   :  { %v41_v33 = vpop.permute.xlu0 %40  ;;  %v61_v34 = vpop.permute.xlu1 %60 }
  0x87   :  { %v47_v36 = vmul.f32 %v46_v30, %v41_v33  ;;  %v67_v39 = vmul.f32 %v66_v32, %v61_v34 }
  0x89   :  { %v48_v38 = vadd.f32 %v47_v36, %v38_v35 }
  0x8b   :  { %v58_v40 = vadd.f32 %v57_v37, %v48_v38 }
  0x8d   :  { %v68_v42 = vadd.f32 %v67_v39, %v58_v40 }
  0x8f   :  { %v76_v43 = vadd.f32 %v329_v41, %v68_v42 }
  0x91   :  { %v77_v44 = vmax.f32 %v76_v43, 0.0 }
  0x93   :  { %v78_v45 = vpack.c.bf16 %v77_v44, %v77_v44 }
  0x95   :  { %383 = vmatmul.mubr.bf16.vlgmr.msra.gmra.mrb[0].mxu0 %v78_v45 }
 0x168   :  { %v184_v49 = vpop.f32.mrb[0].mxu0 }
 0x169   :  { %v185_v50 = vadd.f32 %v330_v48, %v184_v49  ;;  %v384_v51 = vpop.f32.mrb[1].mxu0 }
 0x16a   :  { %v187_v52 = vpop.f32.mrb[2].mxu0 }
 0x16b   :  { %v190_v53 = vmax.f32 %v185_v50, 0.0  ;;  %v385_v54 = vpop.f32.mrb[3].mxu0 }
 0x16d   :  { %v191_v55 = vpack.c.bf16 %v190_v53, %v190_v53 }
 0x16f   :  { %403 = vmatmul.mubr.bf16.vlgmr.msra.gmra.mrb[0].mxu1 %v191_v55 }
 0x242   :  { %v297_v58 = vpop.f32.mrb[0].mxu1 }
 0x243   :  { %v298_v62 = vadd.f32 %v339_v57, %v297_v58  ;;  %v404_v63 = vpop.f32.mrb[1].mxu1 }
 0x244   :  { %v300_v0 = vpop.f32.mrb[2].mxu1 }
 0x245   :  { %v322_v1 = vmul.f32 %v308_v59, %v298_v62  ;;  %v405_v2 = vpop.f32.mrb[3].mxu1  ;;  %v309_v3 = vadd.f32 %v306_v61, %v298_v62 }
 0x247   :  { %v311_v5 = vsel %vm310_vm3, %v309_v3, -inf }
 0x248   :  { %312 = vmax.xlane.f32.xlu1 %v311_v5 }
 0x2d5   :  { %v313_v6 = vpop.xlane.xlu1 %312 }
 0x2d6   :  { %v314_v7 = vsub.f32 %v309_v3, %v313_v6 }
 0x2d8   :  { %v315_v8 = vmul.f32 1.442695, %v314_v7 }
 0x2da   :  { %434 = vpow2.f32 %v315_v8 }
 0x2e4   :  { %v435_v9 = vpop.eup %434 }
 0x2e5   :  { %v317_v10 = vsel %vm310_vm3, %v435_v9, 0.0 }
 0x2e6   :  { %318 = vadd.xlane.f32.xlu0 %v317_v10 }
 0x373   :  { %v319_v4 = vpop.xlane.xlu0 %318 }
 0x374   :  { %436 = vrcp.f32 %v319_v4 }
 0x37e   :  { %v437_v11 = vpop.eup %436 }
 0x37f   :  { %v321_v12 = vmul.f32 %v437_v11, %v435_v9 }
 0x381   :  { %v323_v13 = vadd.f32 %v322_v1, %v321_v12 }
 0x383   :  { %324 = vst.msk [vmem:[%s580_s7] sm:$0xff] %vm310_vm3, %v323_v13 }

</bundles_post_ra>
